<compile_context>
chip_gen: v7x
topology: tpu7x:2x2x1
jax: 0.10.0
libtpu: 0.0.40
codegen_flags: <defaults>
</compile_context>

<pallas_src>
import jax
import jax.numpy as jnp
from jax.experimental import pallas as pl
from jax.experimental.pallas import tpu as pltpu


def _round_up(x, m):
    return ((x + m - 1) // m) * m


def cbm_kernel(x_ref, w_pre_ref, pre_mean_ref, pre_inv_std_ref,
               w_post_ref, post_mean_ref, post_inv_std_ref,
               w_g_ref, b_g_ref,
               logits_ref, pre_ref, post_ref):
    # x tile: bf16 [TB, D0p]; weights pre-transposed to [in, out], bf16.
    x = x_ref[...]

    # Hoist broadcast constants (JAX does not CSE broadcast_in_dim).
    pre_mean = pre_mean_ref[...]
    pre_inv_std = pre_inv_std_ref[...]
    post_mean = post_mean_ref[...]
    post_inv_std = post_inv_std_ref[...]
    b_g = b_g_ref[...]

    # pre_proj_layer: [TB, D0p] @ [D0p, D1p], f32 accumulation on the MXU.
    h = jnp.dot(x, w_pre_ref[...], preferred_element_type=jnp.float32)
    pre_c = (h - pre_mean) * pre_inv_std
    pre_ref[...] = pre_c.astype(pre_ref.dtype)

    # post_proj_layer: bf16 operands, f32 accumulation.
    p = jnp.dot(pre_c.astype(jnp.bfloat16), w_post_ref[...],
                preferred_element_type=jnp.float32)
    post_c = (p - post_mean) * post_inv_std
    post_ref[...] = post_c.astype(post_ref.dtype)

    # final: Linear with bias.
    logits = jnp.dot(post_c.astype(jnp.bfloat16), w_g_ref[...],
                     preferred_element_type=jnp.float32) + b_g
    logits_ref[...] = logits.astype(logits_ref.dtype)


def cbm_forward(x_nchw, pre_W_c, pre_mean, pre_std,
                post_W_c, post_mean, post_std, W_g, b_g):
    # backbone = identity; torch.flatten(x, 1)
    B = x_nchw.shape[0]
    x_flat = x_nchw.reshape(B, -1).astype(jnp.float32)

    D0 = x_flat.shape[1]
    D1 = pre_W_c.shape[0]
    D2 = post_W_c.shape[0]
    n_cls = W_g.shape[0]

    # Lane-dense padding of all minor dims; batch padded to the tile.
    D0p = _round_up(D0, 128)
    D1p = _round_up(D1, 128)
    D2p = _round_up(D2, 128)
    NCp = _round_up(n_cls, 128)

    tile_b = min(256, _round_up(B, 16))
    Bp = _round_up(B, tile_b)

    # x: pad and cast to bf16 for the MXU.
    xp = jnp.zeros((Bp, D0p), jnp.float32).at[:B, :D0].set(x_flat)
    xp = xp.astype(jnp.bfloat16)

    # Pre-transposed, padded, bf16 weights in [in, out] layout.
    w_pre = jnp.zeros((D0p, D1p), jnp.float32).at[:D0, :D1].set(
        pre_W_c.astype(jnp.float32).T).astype(jnp.bfloat16)
    w_post = jnp.zeros((D1p, D2p), jnp.float32).at[:D1, :D2].set(
        post_W_c.astype(jnp.float32).T).astype(jnp.bfloat16)
    w_g = jnp.zeros((D2p, NCp), jnp.float32).at[:D2, :n_cls].set(
        W_g.astype(jnp.float32).T).astype(jnp.bfloat16)

    # Fold 1/std into a multiply; padded lanes get mean=0, inv_std=1 so the
    # padded concepts stay exactly 0 through the chain.
    pre_mean_p = jnp.zeros((1, D1p), jnp.float32).at[:, :D1].set(
        pre_mean.reshape(1, -1).astype(jnp.float32))
    pre_inv_std_p = jnp.ones((1, D1p), jnp.float32).at[:, :D1].set(
        1.0 / pre_std.reshape(1, -1).astype(jnp.float32))
    post_mean_p = jnp.zeros((1, D2p), jnp.float32).at[:, :D2].set(
        post_mean.reshape(1, -1).astype(jnp.float32))
    post_inv_std_p = jnp.ones((1, D2p), jnp.float32).at[:, :D2].set(
        1.0 / post_std.reshape(1, -1).astype(jnp.float32))
    b_g_p = jnp.zeros((1, NCp), jnp.float32).at[:, :n_cls].set(
        b_g.reshape(1, -1).astype(jnp.float32))

    grid = (Bp // tile_b,)

    in_specs = [
        pl.BlockSpec((tile_b, D0p), lambda i: (i, 0)),   # x tile (pipelined)
        pl.BlockSpec((D0p, D1p), lambda i: (0, 0)),      # resident weights
        pl.BlockSpec((1, D1p), lambda i: (0, 0)),
        pl.BlockSpec((1, D1p), lambda i: (0, 0)),
        pl.BlockSpec((D1p, D2p), lambda i: (0, 0)),
        pl.BlockSpec((1, D2p), lambda i: (0, 0)),
        pl.BlockSpec((1, D2p), lambda i: (0, 0)),
        pl.BlockSpec((D2p, NCp), lambda i: (0, 0)),
        pl.BlockSpec((1, NCp), lambda i: (0, 0)),
    ]
    out_specs = (
        pl.BlockSpec((tile_b, NCp), lambda i: (i, 0)),   # logits
        pl.BlockSpec((tile_b, D1p), lambda i: (i, 0)),   # pre_proj_c
        pl.BlockSpec((tile_b, D2p), lambda i: (i, 0)),   # post_proj_c
    )
    out_shapes = (
        jax.ShapeDtypeStruct((Bp, NCp), jnp.float32),
        jax.ShapeDtypeStruct((Bp, D1p), jnp.float32),
        jax.ShapeDtypeStruct((Bp, D2p), jnp.float32),
    )

    flops = 2 * Bp * (D0p * D1p + D1p * D2p + D2p * NCp)
    bytes_accessed = (
        2 * (Bp * D0p + D0p * D1p + D1p * D2p + D2p * NCp)      # bf16 inputs
        + 4 * Bp * (NCp + D1p + D2p)                            # f32 outputs
        + 4 * (2 * D1p + 2 * D2p + NCp))                        # consts
    cost = pl.CostEstimate(flops=flops, transcendentals=0,
                           bytes_accessed=bytes_accessed)

    # VMEM footprint: resident bf16 weights + double-buffered x / out tiles.
    vmem_bytes = (
        2 * (D0p * D1p + D1p * D2p + D2p * NCp)
        + 2 * 2 * tile_b * D0p
        + 2 * 4 * tile_b * (NCp + D1p + D2p)
        + 4 * (2 * D1p + 2 * D2p + NCp))
    vmem_limit = int(min(max(2 * vmem_bytes, 16 * 2**20), 64 * 2**20))

    logits_p, pre_p, post_p = pl.pallas_call(
        cbm_kernel,
        out_shape=out_shapes,
        grid=grid,
        in_specs=in_specs,
        out_specs=out_specs,
        compiler_params=pltpu.CompilerParams(
            dimension_semantics=("parallel",),
            vmem_limit_bytes=vmem_limit),
        cost_estimate=cost,
    )(xp, w_pre, pre_mean_p, pre_inv_std_p,
      w_post, post_mean_p, post_inv_std_p, w_g, b_g_p)

    # Strip batch / lane padding.
    return (logits_p[:B, :n_cls], pre_p[:B, :D1], post_p[:B, :D2])


def reference_forward(x_nchw, pre_W_c, pre_mean, pre_std,
                      post_W_c, post_mean, post_std, W_g, b_g):
    B = x_nchw.shape[0]
    x = x_nchw.reshape(B, -1).astype(jnp.float32)
    h = x @ pre_W_c.T
    pre_c = (h - pre_mean.reshape(1, -1)) / pre_std.reshape(1, -1)
    p = pre_c @ post_W_c.T
    post_c = (p - post_mean.reshape(1, -1)) / post_std.reshape(1, -1)
    logits = post_c @ W_g.T + b_g.reshape(1, -1)
    return logits, pre_c, post_c


if __name__ == "__main__":
    # Small shapes consistent with the forward pass.
    B, C, H, W = 2, 4, 16, 16          # input image-like tensor (NCHW)
    D0 = C * H * W                      # flattened backbone feature dim = 1024
    D1 = 128                            # number of pre-projection concepts
    D2 = 64                             # number of post-projection concepts
    NCLS = 8                            # number of classes

    key = jax.random.PRNGKey(0)
    ks = jax.random.split(key, 9)

    x = jax.random.normal(ks[0], (B, C, H, W), dtype=jnp.float32)

    pre_W_c = jax.random.normal(ks[1], (D1, D0), dtype=jnp.float32) * 0.02
    post_W_c = jax.random.normal(ks[2], (D2, D1), dtype=jnp.float32) * 0.05
    W_g = jax.random.normal(ks[3], (NCLS, D2), dtype=jnp.float32) * 0.1
    b_g = jax.random.normal(ks[4], (NCLS,), dtype=jnp.float32) * 0.1

    pre_mean = jax.random.normal(ks[5], (1, D1), dtype=jnp.float32) * 0.1
    pre_std = jnp.abs(jax.random.normal(ks[6], (1, D1), dtype=jnp.float32)) + 0.5
    post_mean = jax.random.normal(ks[7], (1, D2), dtype=jnp.float32) * 0.1
    post_std = jnp.abs(jax.random.normal(ks[8], (1, D2), dtype=jnp.float32)) + 0.5

    logits, pre_c, post_c = cbm_forward(
        x, pre_W_c, pre_mean, pre_std,
        post_W_c, post_mean, post_std, W_g, b_g)
    jax.block_until_ready((logits, pre_c, post_c))

    # Correctness check against pure-JAX f32 reference (bf16 matmul operands in
    # the kernel => loosened tolerance).
    ref_logits, ref_pre, ref_post = reference_forward(
        x, pre_W_c, pre_mean, pre_std,
        post_W_c, post_mean, post_std, W_g, b_g)

    assert logits.shape == (B, NCLS)
    assert pre_c.shape == (B, D1)
    assert post_c.shape == (B, D2)
    assert jnp.allclose(logits, ref_logits, atol=5e-2, rtol=5e-2)
    assert jnp.allclose(pre_c, ref_pre, atol=5e-2, rtol=5e-2)
    assert jnp.allclose(post_c, ref_post, atol=5e-2, rtol=5e-2)

    print("KERNEL_OK")
</pallas_src>

<mosaic_0001>
module attributes {stable_mosaic.version = 11 : i64} {
  func.func @cbm_kernel(%arg0: i32, %arg1: memref<16x1024xbf16, #tpu.memory_space<vmem>>, %arg2: memref<1024x128xbf16, #tpu.memory_space<vmem>>, %arg3: memref<1x128xf32, #tpu.memory_space<vmem>>, %arg4: memref<1x128xf32, #tpu.memory_space<vmem>>, %arg5: memref<128x128xbf16, #tpu.memory_space<vmem>>, %arg6: memref<1x128xf32, #tpu.memory_space<vmem>>, %arg7: memref<1x128xf32, #tpu.memory_space<vmem>>, %arg8: memref<128x128xbf16, #tpu.memory_space<vmem>>, %arg9: memref<1x128xf32, #tpu.memory_space<vmem>>, %arg10: memref<16x128xf32, #tpu.memory_space<vmem>>, %arg11: memref<16x128xf32, #tpu.memory_space<vmem>>, %arg12: memref<16x128xf32, #tpu.memory_space<vmem>>) attributes {dimension_semantics = [#tpu.dimension_semantics<parallel>], iteration_bounds = array<i64: 1>, scalar_prefetch = 0 : i64, scratch_operands = 0 : i64, tpu.core_type = #tpu.core_type<tc>, window_params = [{transform_indices = @transform_0, window_bounds = array<i64: 16, 1024>}, {pipeline_mode = #tpu.pipeline_mode<synchronous>, transform_indices = @transform_1, window_bounds = array<i64: 1024, 128>}, {pipeline_mode = #tpu.pipeline_mode<synchronous>, transform_indices = @transform_2, window_bounds = array<i64: 1, 128>}, {pipeline_mode = #tpu.pipeline_mode<synchronous>, transform_indices = @transform_3, window_bounds = array<i64: 1, 128>}, {pipeline_mode = #tpu.pipeline_mode<synchronous>, transform_indices = @transform_4, window_bounds = array<i64: 128, 128>}, {pipeline_mode = #tpu.pipeline_mode<synchronous>, transform_indices = @transform_5, window_bounds = array<i64: 1, 128>}, {pipeline_mode = #tpu.pipeline_mode<synchronous>, transform_indices = @transform_6, window_bounds = array<i64: 1, 128>}, {pipeline_mode = #tpu.pipeline_mode<synchronous>, transform_indices = @transform_7, window_bounds = array<i64: 128, 128>}, {pipeline_mode = #tpu.pipeline_mode<synchronous>, transform_indices = @transform_8, window_bounds = array<i64: 1, 128>}, {transform_indices = @transform_9, window_bounds = array<i64: 16, 128>}, {transform_indices = @transform_10, window_bounds = array<i64: 16, 128>}, {transform_indices = @transform_11, window_bounds = array<i64: 16, 128>}]} {
    %c0 = arith.constant 0 : index
    %c0_0 = arith.constant 0 : index
    %0 = vector.load %arg1[%c0, %c0_0] : memref<16x1024xbf16, #tpu.memory_space<vmem>>, vector<16x1024xbf16>
    %c0_1 = arith.constant 0 : index
    %c0_2 = arith.constant 0 : index
    %1 = vector.load %arg3[%c0_1, %c0_2] : memref<1x128xf32, #tpu.memory_space<vmem>>, vector<1x128xf32>
    %c0_3 = arith.constant 0 : index
    %c0_4 = arith.constant 0 : index
    %2 = vector.load %arg4[%c0_3, %c0_4] : memref<1x128xf32, #tpu.memory_space<vmem>>, vector<1x128xf32>
    %c0_5 = arith.constant 0 : index
    %c0_6 = arith.constant 0 : index
    %3 = vector.load %arg6[%c0_5, %c0_6] : memref<1x128xf32, #tpu.memory_space<vmem>>, vector<1x128xf32>
    %c0_7 = arith.constant 0 : index
    %c0_8 = arith.constant 0 : index
    %4 = vector.load %arg7[%c0_7, %c0_8] : memref<1x128xf32, #tpu.memory_space<vmem>>, vector<1x128xf32>
    %c0_9 = arith.constant 0 : index
    %c0_10 = arith.constant 0 : index
    %5 = vector.load %arg9[%c0_9, %c0_10] : memref<1x128xf32, #tpu.memory_space<vmem>>, vector<1x128xf32>
    %c0_11 = arith.constant 0 : index
    %c0_12 = arith.constant 0 : index
    %6 = vector.load %arg2[%c0_11, %c0_12] : memref<1024x128xbf16, #tpu.memory_space<vmem>>, vector<1024x128xbf16>
    %cst = arith.constant dense<0.000000e+00> : vector<16x128xf32>
    %7 = tpu.matmul %0, %6, %cst {dimension_numbers = #tpu.dot_dimension_numbers<[1], [0], [0], [1], [0, 0, 1, 1], [], []>} : vector<16x1024xbf16>, vector<1024x128xbf16>, vector<16x128xf32> -> vector<16x128xf32>
    %8 = vector.broadcast %1 : vector<1x128xf32> to vector<16x128xf32>
    %9 = arith.subf %7, %8 : vector<16x128xf32>
    %10 = vector.broadcast %2 : vector<1x128xf32> to vector<16x128xf32>
    %11 = arith.mulf %9, %10 : vector<16x128xf32>
    %c0_13 = arith.constant 0 : index
    %c0_14 = arith.constant 0 : index
    %12 = vector.load %arg11[%c0_13, %c0_14] : memref<16x128xf32, #tpu.memory_space<vmem>>, vector<16x128xf32>
    tpu.vector_store %arg11[%c0_13, %c0_14], %11 {strides = array<i32>} : memref<16x128xf32, #tpu.memory_space<vmem>>, vector<16x128xf32>,
    %13 = arith.truncf %11 : vector<16x128xf32> to vector<16x128xbf16>
    %c0_15 = arith.constant 0 : index
    %c0_16 = arith.constant 0 : index
    %14 = vector.load %arg5[%c0_15, %c0_16] : memref<128x128xbf16, #tpu.memory_space<vmem>>, vector<128x128xbf16>
    %cst_17 = arith.constant dense<0.000000e+00> : vector<16x128xf32>
    %15 = tpu.matmul %13, %14, %cst_17 {dimension_numbers = #tpu.dot_dimension_numbers<[1], [0], [0], [1], [0, 0, 1, 1], [], []>} : vector<16x128xbf16>, vector<128x128xbf16>, vector<16x128xf32> -> vector<16x128xf32>
    %16 = vector.broadcast %3 : vector<1x128xf32> to vector<16x128xf32>
    %17 = arith.subf %15, %16 : vector<16x128xf32>
    %18 = vector.broadcast %4 : vector<1x128xf32> to vector<16x128xf32>
    %19 = arith.mulf %17, %18 : vector<16x128xf32>
    %c0_18 = arith.constant 0 : index
    %c0_19 = arith.constant 0 : index
    %20 = vector.load %arg12[%c0_18, %c0_19] : memref<16x128xf32, #tpu.memory_space<vmem>>, vector<16x128xf32>
    tpu.vector_store %arg12[%c0_18, %c0_19], %19 {strides = array<i32>} : memref<16x128xf32, #tpu.memory_space<vmem>>, vector<16x128xf32>,
    %21 = arith.truncf %19 : vector<16x128xf32> to vector<16x128xbf16>
    %c0_20 = arith.constant 0 : index
    %c0_21 = arith.constant 0 : index
    %22 = vector.load %arg8[%c0_20, %c0_21] : memref<128x128xbf16, #tpu.memory_space<vmem>>, vector<128x128xbf16>
    %cst_22 = arith.constant dense<0.000000e+00> : vector<16x128xf32>
    %23 = tpu.matmul %21, %22, %cst_22 {dimension_numbers = #tpu.dot_dimension_numbers<[1], [0], [0], [1], [0, 0, 1, 1], [], []>} : vector<16x128xbf16>, vector<128x128xbf16>, vector<16x128xf32> -> vector<16x128xf32>
    %24 = vector.broadcast %5 : vector<1x128xf32> to vector<16x128xf32>
    %25 = arith.addf %23, %24 : vector<16x128xf32>
    %c0_23 = arith.constant 0 : index
    %c0_24 = arith.constant 0 : index
    %26 = vector.load %arg10[%c0_23, %c0_24] : memref<16x128xf32, #tpu.memory_space<vmem>>, vector<16x128xf32>
    tpu.vector_store %arg10[%c0_23, %c0_24], %25 {strides = array<i32>} : memref<16x128xf32, #tpu.memory_space<vmem>>, vector<16x128xf32>,
    return
  }
  func.func @transform_0(%arg0: i32) -> (i32, i32) {
    %c0_i32 = arith.constant 0 : i32
    %c0_i32_0 = arith.constant 0 : i32
    return %arg0, %c0_i32 : i32, i32
  }
  func.func @transform_1(%arg0: i32) -> (i32, i32) {
    %c0_i32 = arith.constant 0 : i32
    %c0_i32_0 = arith.constant 0 : i32
    %c0_i32_1 = arith.constant 0 : i32
    return %c0_i32, %c0_i32_0 : i32, i32
  }
  func.func @transform_2(%arg0: i32) -> (i32, i32) {
    %c0_i32 = arith.constant 0 : i32
    %c0_i32_0 = arith.constant 0 : i32
    %c0_i32_1 = arith.constant 0 : i32
    return %c0_i32, %c0_i32_0 : i32, i32
  }
  func.func @transform_3(%arg0: i32) -> (i32, i32) {
    %c0_i32 = arith.constant 0 : i32
    %c0_i32_0 = arith.constant 0 : i32
    %c0_i32_1 = arith.constant 0 : i32
    return %c0_i32, %c0_i32_0 : i32, i32
  }
  func.func @transform_4(%arg0: i32) -> (i32, i32) {
    %c0_i32 = arith.constant 0 : i32
    %c0_i32_0 = arith.constant 0 : i32
    %c0_i32_1 = arith.constant 0 : i32
    return %c0_i32, %c0_i32_0 : i32, i32
  }
  func.func @transform_5(%arg0: i32) -> (i32, i32) {
    %c0_i32 = arith.constant 0 : i32
    %c0_i32_0 = arith.constant 0 : i32
    %c0_i32_1 = arith.constant 0 : i32
    return %c0_i32, %c0_i32_0 : i32, i32
  }
  func.func @transform_6(%arg0: i32) -> (i32, i32) {
    %c0_i32 = arith.constant 0 : i32
    %c0_i32_0 = arith.constant 0 : i32
    %c0_i32_1 = arith.constant 0 : i32
    return %c0_i32, %c0_i32_0 : i32, i32
  }
  func.func @transform_7(%arg0: i32) -> (i32, i32) {
    %c0_i32 = arith.constant 0 : i32
    %c0_i32_0 = arith.constant 0 : i32
    %c0_i32_1 = arith.constant 0 : i32
    return %c0_i32, %c0_i32_0 : i32, i32
  }
  func.func @transform_8(%arg0: i32) -> (i32, i32) {
    %c0_i32 = arith.constant 0 : i32
    %c0_i32_0 = arith.constant 0 : i32
    %c0_i32_1 = arith.constant 0 : i32
    return %c0_i32, %c0_i32_0 : i32, i32
  }
  func.func @transform_9(%arg0: i32) -> (i32, i32) {
    %c0_i32 = arith.constant 0 : i32
    %c0_i32_0 = arith.constant 0 : i32
    return %arg0, %c0_i32 : i32, i32
  }
  func.func @transform_10(%arg0: i32) -> (i32, i32) {
    %c0_i32 = arith.constant 0 : i32
    %c0_i32_0 = arith.constant 0 : i32
    return %arg0, %c0_i32 : i32, i32
  }
  func.func @transform_11(%arg0: i32) -> (i32, i32) {
    %c0_i32 = arith.constant 0 : i32
    %c0_i32_0 = arith.constant 0 : i32
    return %arg0, %c0_i32 : i32, i32
  }
}

</mosaic_0001>

<bundles_post_ra>
// kernel: tpu_custom_call.1
= control target key start
LH: loop header
LB: loop body
LE: loop exit
PB: predicated region body
PF: predicated region fallthrough
CT: control target
= control target key end

     0   :  { %17 = vsyncpa [#allocation3], 0  ;;  %s1843_s0 = inlined_call_operand.hbm [shape: bf16[16,1024], index: 0, kind: input, shape index: {}]   ;;  %s1844_s1 = inlined_call_operand.hbm [shape: bf16[1024,128], index: 1, kind: input, shape index: {}]   ;;  %s1845_s2 = inlined_call_operand.vmem [shape: f32[1,128], index: 2, kind: input, shape index: {}]   ;;  %s1846_s3 = inlined_call_operand.vmem [shape: f32[1,128], index: 3, kind: input, shape index: {}]   ;;  %s1847_s4 = inlined_call_operand.hbm [shape: bf16[128,128], index: 4, kind: input, shape index: {}]   ;;  %s1848_s5 = inlined_call_operand.vmem [shape: f32[1,128], index: 5, kind: input, shape index: {}]   ;;  %s1849_s6 = inlined_call_operand.vmem [shape: f32[1,128], index: 6, kind: input, shape index: {}]   ;;  %s1850_s7 = inlined_call_operand.hbm [shape: bf16[128,128], index: 7, kind: input, shape index: {}]   ;;  %s1851_s8 = inlined_call_operand.vmem [shape: f32[1,128], index: 8, kind: input, shape index: {}]   ;;  %s1852_s9 = inlined_call_operand.hbm [shape: f32[16,128], index: 9, kind: output, shape index: {0}]   ;;  %s1853_s10 = inlined_call_operand.hbm [shape: f32[16,128], index: 10, kind: output, shape index: {1}]   ;;  %s1854_s11 = inlined_call_operand.hbm [shape: f32[16,128], index: 11, kind: output, shape index: {2}]  }
   0x1   :  { %18 = vsyncpa [#allocation6], 0 }
   0x2   :  { %19 = vsyncpa [#allocation9], 0 }
   0x3   :  { %20 = vsyncpa [#allocation4], 0 }
   0x4   :  { %21 = vsyncpa [#allocation12], 0  ;;  %s1626_s17 = smov [#allocation5]   ;;  %s1462_s21 = scalar_lea.hbm %s1844_s1, 8192 }
   0x5   :  { %s39_s18 = sshll.u32 %s1626_s17, 4  ;;  %p1463_p0 = scmp.ne.s32.totalorder %s1844_s1, %s1462_s21  ;;  %s40_s18 = int_to_ptr.vmem [resolvable:$true] %s39_s18 }
   0x6   :  { %p1466_p1 = scmp.lt.u32.totalorder %s1462_s21, %s1844_s1 }
   0x8   :  { %p1468_p2 = pnand %p1466_p1, %p1463_p0 }
   0xa   :  { %1471 = shalt.err (!%p1468_p2)
}
   0xb   :  { %s1472_s26 = scalar_lea.vmem %s40_s18, 8192  ;;  %p1477_p4 = scmp.lt.s32.totalorder %s40_s18, %s40_s18 }
   0xc   :  { %p1473_p3 = scmp.ne.s32.totalorder %s40_s18, %s1472_s26  ;;  %p1478_p5 = scmp.lt.s32.totalorder %s1472_s26, %s1472_s26 }
   0xe   :  { %p1479_p6 = por %p1478_p5, %p1477_p4 }
  0x10   :  { %p1480_p7 = pnand %p1479_p6, %p1473_p3 }
  0x12   :  { %1483 = shalt.err (!%p1480_p7)
}
  0x13   :  { %s1627_s27 = smov 64   ;;  %s1628_s28 = smov 4  }
  0x14   :  { %45 = dma.hbm_to_vmem [thread:$0]  %s1844_s1, 8192, %s40_s18, [#allocation6], %s1627_s27, %s1627_s27, %s1628_s28  }
  0x15   :  { %s1629_s12 = smov [#allocation2]   ;;  %s1484_s16 = scalar_lea.hbm %s1843_s0, 1024 }
  0x16   :  { %s27_s13 = sshll.u32 %s1629_s12, 4  ;;  %p1485_p8 = scmp.ne.s32.totalorder %s1843_s0, %s1484_s16  ;;  %s28_s13 = int_to_ptr.vmem [resolvable:$true] %s27_s13 }
  0x17   :  { %p1488_p9 = scmp.lt.u32.totalorder %s1484_s16, %s1843_s0 }
  0x19   :  { %p1490_p10 = pnand %p1488_p9, %p1485_p8 }
  0x1b   :  { %1493 = shalt.err (!%p1490_p10)
}
  0x1c   :  { %s1494_s22 = scalar_lea.vmem %s28_s13, 1024  ;;  %p1499_p12 = scmp.lt.s32.totalorder %s28_s13, %s28_s13 }
  0x1d   :  { %p1495_p11 = scmp.ne.s32.totalorder %s28_s13, %s1494_s22  ;;  %p1500_p13 = scmp.lt.s32.totalorder %s1494_s22, %s1494_s22 }
  0x1f   :  { %p1501_p0 = por %p1500_p13, %p1499_p12 }
  0x21   :  { %p1502_p1 = pnand %p1501_p0, %p1495_p11 }
  0x23   :  { %1505 = shalt.err (!%p1502_p1)
}
  0x24   :  { %s1630_s1 = smov 512   ;;  %s1631_s18 = smov 32  }
  0x25   :  { %33 = dma.hbm_to_vmem [thread:$0]  %s1843_s0, 1024, %s28_s13, [#allocation3], %s1630_s1, %s1630_s1, %s1631_s18  }
  0x26   :  { %s1632_s25 = smov [#allocation7]   ;;  %s1633_s29 = smov [#allocation8]  }
  0x27   :  { %s55_s26 = sshll.u32 %s1632_s25, 4  ;;  %s71_s30 = sshll.u32 %s1633_s29, 4  ;;  %s56_s26 = int_to_ptr.vmem [resolvable:$true] %s55_s26  ;;  %s1728_s30 = int_to_ptr.vmem [resolvable:$true] %s71_s30 }
  0x28   :  { %s1506_s15 = scalar_lea.hbm %s1847_s4, 1024 }
  0x29   :  { %p1507_p2 = scmp.ne.s32.totalorder %s1847_s4, %s1506_s15  ;;  %p1510_p3 = scmp.lt.u32.totalorder %s1506_s15, %s1847_s4 }
  0x2b   :  { %p1512_p4 = pnand %p1510_p3, %p1507_p2 }
  0x2d   :  { %1515 = shalt.err (!%p1512_p4)
}
  0x2e   :  { %s1516_s0 = scalar_lea.vmem %s56_s26, 1024  ;;  %p1521_p6 = scmp.lt.s32.totalorder %s56_s26, %s56_s26 }
  0x2f   :  { %p1517_p5 = scmp.ne.s32.totalorder %s56_s26, %s1516_s0  ;;  %p1522_p7 = scmp.lt.s32.totalorder %s1516_s0, %s1516_s0 }
  0x31   :  { %p1523_p8 = por %p1522_p7, %p1521_p6 }
  0x33   :  { %p1524_p9 = pnand %p1523_p8, %p1517_p5 }
  0x35   :  { %1527 = shalt.err (!%p1524_p9)
}
  0x36   :  { %61 = dma.hbm_to_vmem [thread:$0]  %s1847_s4, 1024, %s56_s26, [#allocation6], %s1627_s27, %s1627_s27, %s1628_s28  }
  0x37   :  { %s1528_s18 = scalar_lea.hbm %s1850_s7, 1024 }
  0x38   :  { %p1529_p10 = scmp.ne.s32.totalorder %s1850_s7, %s1528_s18  ;;  %p1532_p11 = scmp.lt.u32.totalorder %s1528_s18, %s1850_s7 }
  0x3a   :  { %p1534_p12 = pnand %p1532_p11, %p1529_p10 }
  0x3c   :  { %1537 = shalt.err (!%p1534_p12)
}
  0x3d   :  { %s1538_s12 = scalar_lea.vmem %s1728_s30, 1024  ;;  %p1543_p0 = scmp.lt.s32.totalorder %s1728_s30, %s1728_s30 }
  0x3e   :  { %p1539_p13 = scmp.ne.s32.totalorder %s1728_s30, %s1538_s12  ;;  %p1544_p1 = scmp.lt.s32.totalorder %s1538_s12, %s1538_s12 }
  0x40   :  { %p1545_p2 = por %p1544_p1, %p1543_p0 }
  0x42   :  { %p1546_p3 = pnand %p1545_p2, %p1539_p13 }
  0x44   :  { %1549 = shalt.err (!%p1546_p3)
}
  0x45   :  { %77 = dma.hbm_to_vmem [thread:$0]  %s1850_s7, 1024, %s1728_s30, [#allocation9], %s1627_s27, %s1627_s27, %s1628_s28  }
  0x46   :  { %1616 = dma.done.wait [#allocation3], 1024  }
  0x47   :  { %1617 = vsyncadd [#allocation3], 4294966272 }
  0x48   :  { %1618 = dma.done.wait [#allocation6], 9216  }
  0x49   :  { %1619 = vsyncadd [#allocation6], 4294958080 }
  0x4a   :  { %1620 = dma.done.wait [#allocation9], 1024  }
  0x4b   :  { %1621 = vsyncadd [#allocation9], 4294966272  ;;  %v1382_v0 = vld [vmem:[#allocation5 + $0x40] sm:$0xff]   ;;  %v1386_v4 = vld [vmem:[#allocation5 + $0x48] sm:$0xff]   ;;  %vm1635_vm0 = vmmov 0   ;;  %s1636_s16 = smov [#allocation11]  }
  0x4c   :  { %v1383_v1 = vld [vmem:[#allocation5 + $0xc0] sm:$0xff]   ;;  %1221 = vmatprep.subr.bf16.mxu0 %v1382_v0  ;;  %v1387_v5 = vld [vmem:[#allocation5 + $0xc8] sm:$0xff]   ;;  %v1390_v8 = vld [vmem:[#allocation5 + $0x50] sm:$0xff]   ;;  %s1095_s17 = sshll.u32 %s1636_s16, 4  ;;  %s1096_s17 = int_to_ptr.vmem [resolvable:$true] %s1095_s17 }
  0x4d   :  { %v1384_v2 = vld [vmem:[#allocation5] sm:$0xff]   ;;  %1243 = vmatprep.subr.bf16.mxu1 %v1383_v1  ;;  %v1388_v6 = vld [vmem:[#allocation5 + $0x8] sm:$0xff]   ;;  %v1391_v9 = vld [vmem:[#allocation5 + $0xd0] sm:$0xff]   ;;  %p1555_p5 = scmp.lt.s32.totalorder %s1096_s17, %s1096_s17 }
  0x4e   :  { %v1385_v3 = vld [vmem:[#allocation5 + $0x80] sm:$0xff]   ;;  %1222 = vmatpush3.bf16.msra.mxu0 %v1384_v2  ;;  %v1389_v7 = vld [vmem:[#allocation5 + $0x88] sm:$0xff]   ;;  %v1392_v10 = vld [vmem:[#allocation5 + $0x10] sm:$0xff]  }
  0x4f   :  { %1244 = vmatpush3.bf16.msra.mxu1 %v1385_v3  ;;  %1223 = vmatprep.subr.bf16.mxu0 %v1386_v4  ;;  %v1393_v11 = vld [vmem:[#allocation5 + $0x90] sm:$0xff]   ;;  %v1394_v12 = vld [vmem:[#allocation5 + $0x58] sm:$0xff]   ;;  %v1398_v16 = vld [vmem:[#allocation5 + $0x60] sm:$0xff]  }
  0x50   :  { %1245 = vmatprep.subr.bf16.mxu1 %v1387_v5  ;;  %v1395_v13 = vld [vmem:[#allocation5 + $0xd8] sm:$0xff]   ;;  %v1399_v17 = vld [vmem:[#allocation5 + $0xe0] sm:$0xff]   ;;  %v1402_v20 = vld [vmem:[#allocation5 + $0x68] sm:$0xff]  }
  0x51   :  { %v1396_v14 = vld [vmem:[#allocation5 + $0x18] sm:$0xff]   ;;  %v1400_v18 = vld [vmem:[#allocation5 + $0x20] sm:$0xff]   ;;  %v1403_v21 = vld [vmem:[#allocation5 + $0xe8] sm:$0xff]  }
  0x52   :  { %1224 = vmatpush3.bf16.msra.mxu0 %v1388_v6  ;;  %v1397_v15 = vld [vmem:[#allocation5 + $0x98] sm:$0xff]   ;;  %v1401_v19 = vld [vmem:[#allocation5 + $0xa0] sm:$0xff]   ;;  %v1404_v22 = vld [vmem:[#allocation5 + $0x28] sm:$0xff]  }
  0x53   :  { %1246 = vmatpush3.bf16.msra.mxu1 %v1389_v7  ;;  %1225 = vmatprep.subr.bf16.mxu0 %v1390_v8  ;;  %v1405_v23 = vld [vmem:[#allocation5 + $0xa8] sm:$0xff]   ;;  %v1406_v24 = vld [vmem:[#allocation5 + $0x70] sm:$0xff]   ;;  %v1410_v28 = vld [vmem:[#allocation5 + $0x78] sm:$0xff]  }
  0x54   :  { %1247 = vmatprep.subr.bf16.mxu1 %v1391_v9  ;;  %v1407_v25 = vld [vmem:[#allocation5 + $0xf0] sm:$0xff]   ;;  %v1411_v29 = vld [vmem:[#allocation5 + $0xf8] sm:$0xff]   ;;  %v93_v32 = vld [vmem:[#allocation2] sm:$0xff] }
  0x55   :  { %v1408_v26 = vld [vmem:[#allocation5 + $0x30] sm:$0xff]   ;;  %v1412_v30 = vld [vmem:[#allocation5 + $0x38] sm:$0xff]   ;;  %v97_v33 = vld [vmem:[#allocation2 + $0x20] sm:$0xff] }
  0x56   :  { %1226 = vmatpush3.bf16.msra.mxu0 %v1392_v10  ;;  %v1409_v27 = vld [vmem:[#allocation5 + $0xb0] sm:$0xff]   ;;  %v1413_v31 = vld [vmem:[#allocation5 + $0xb8] sm:$0xff]   ;;  %v94_v34 = vld [vmem:[#allocation2 + $0x8] sm:$0xff]  ;;  %v1128_v35 = vcombine.low %v93_v32, %v97_v33  ;;  %v1129_v36 = vcombine.high %v93_v32, %v97_v33 }
  0x57   :  { %1248 = vmatpush3.bf16.msra.mxu1 %v1393_v11  ;;  %1227 = vmatprep.subr.bf16.mxu0 %v1394_v12  ;;  %v98_v37 = vld [vmem:[#allocation2 + $0x28] sm:$0xff]  ;;  %v1414_v40 = vld [vmem:[#allocation5 + $0x140] sm:$0xff]   ;;  %v1422_v48 = vld [vmem:[#allocation5 + $0x150] sm:$0xff]  }
  0x58   :  { %1249 = vmatprep.subr.bf16.mxu1 %v1395_v13  ;;  %v1130_v38 = vcombine.low %v94_v34, %v98_v37  ;;  %v1131_v39 = vcombine.high %v94_v34, %v98_v37  ;;  %690 = vmatprep.mubr.bf16.mxu0 %v1129_v36  ;;  %v1415_v41 = vld [vmem:[#allocation5 + $0x1c0] sm:$0xff]   ;;  %v1418_v44 = vld [vmem:[#allocation5 + $0x148] sm:$0xff]   ;;  %v1423_v49 = vld [vmem:[#allocation5 + $0x1d0] sm:$0xff]  }
  0x59   :  { %v1416_v42 = vld [vmem:[#allocation5 + $0x100] sm:$0xff]   ;;  %v1419_v45 = vld [vmem:[#allocation5 + $0x1c8] sm:$0xff]   ;;  %v1424_v50 = vld [vmem:[#allocation5 + $0x110] sm:$0xff]  }
  0x5a   :  { %1228 = vmatpush3.bf16.msra.mxu0 %v1396_v14  ;;  %731 = vmatprep.mubr.bf16.mxu1 %v1131_v39  ;;  %v1417_v43 = vld [vmem:[#allocation5 + $0x180] sm:$0xff]   ;;  %v1420_v46 = vld [vmem:[#allocation5 + $0x108] sm:$0xff]   ;;  %v1425_v51 = vld [vmem:[#allocation5 + $0x190] sm:$0xff]  }
  0x5b   :  { %1250 = vmatpush3.bf16.msra.mxu1 %v1397_v15  ;;  %1229 = vmatprep.subr.bf16.mxu0 %v1398_v16  ;;  %v1421_v47 = vld [vmem:[#allocation5 + $0x188] sm:$0xff]   ;;  %v1426_v52 = vld [vmem:[#allocation5 + $0x158] sm:$0xff]   ;;  %v1430_v56 = vld [vmem:[#allocation5 + $0x160] sm:$0xff]  }
  0x5c   :  { %1251 = vmatprep.subr.bf16.mxu1 %v1399_v17  ;;  %v1427_v53 = vld [vmem:[#allocation5 + $0x1d8] sm:$0xff]   ;;  %v1431_v57 = vld [vmem:[#allocation5 + $0x1e0] sm:$0xff]   ;;  %v1434_v60 = vld [vmem:[#allocation5 + $0x168] sm:$0xff]   ;;  %v1634_v17 = vmov 0.0  }
  0x5d   :  { %v1428_v54 = vld [vmem:[#allocation5 + $0x118] sm:$0xff]   ;;  %v1432_v58 = vld [vmem:[#allocation5 + $0x120] sm:$0xff]   ;;  %v1435_v61 = vld [vmem:[#allocation5 + $0x1e8] sm:$0xff]  }
  0x5e   :  { %1230 = vmatpush3.bf16.msra.mxu0 %v1400_v18  ;;  %v1429_v55 = vld [vmem:[#allocation5 + $0x198] sm:$0xff]   ;;  %v1433_v59 = vld [vmem:[#allocation5 + $0x1a0] sm:$0xff]   ;;  %v1436_v62 = vld [vmem:[#allocation5 + $0x128] sm:$0xff]  }
  0x5f   :  { %1252 = vmatpush3.bf16.msra.mxu1 %v1401_v19  ;;  %1231 = vmatprep.subr.bf16.mxu0 %v1402_v20  ;;  %v1437_v63 = vld [vmem:[#allocation5 + $0x1a8] sm:$0xff]   ;;  %v1438_v0 = vld [vmem:[#allocation5 + $0x170] sm:$0xff]   ;;  %v1442_v4 = vld [vmem:[#allocation5 + $0x178] sm:$0xff]  }
  0x60   :  { %1253 = vmatprep.subr.bf16.mxu1 %v1403_v21  ;;  %v1439_v1 = vld [vmem:[#allocation5 + $0x1f0] sm:$0xff]   ;;  %v1443_v5 = vld [vmem:[#allocation5 + $0x1f8] sm:$0xff]   ;;  %v1446_v16 = vld [vmem:[#allocation7] sm:$0xff]  }
  0x61   :  { %v1440_v2 = vld [vmem:[#allocation5 + $0x130] sm:$0xff]   ;;  %v1444_v6 = vld [vmem:[#allocation5 + $0x138] sm:$0xff]   ;;  %v1447_v18 = vld [vmem:[#allocation7 + $0x8] sm:$0xff]  }
  0x62   :  { %1232 = vmatpush3.bf16.msra.mxu0 %v1404_v22  ;;  %v1441_v3 = vld [vmem:[#allocation5 + $0x1b0] sm:$0xff]   ;;  %v1445_v7 = vld [vmem:[#allocation5 + $0x1b8] sm:$0xff]   ;;  %v1450_v21 = vld [vmem:[#allocation7 + $0x20] sm:$0xff]  }
  0x63   :  { %1254 = vmatpush3.bf16.msra.mxu1 %v1405_v23  ;;  %1233 = vmatprep.subr.bf16.mxu0 %v1406_v24  ;;  %v95_v8 = vld [vmem:[#allocation2 + $0x10] sm:$0xff]  ;;  %v96_v12 = vld [vmem:[#allocation2 + $0x18] sm:$0xff]  ;;  %v1451_v22 = vld [vmem:[#allocation7 + $0x28] sm:$0xff]  }
  0x64   :  { %1255 = vmatprep.subr.bf16.mxu1 %v1407_v25  ;;  %v99_v9 = vld [vmem:[#allocation2 + $0x30] sm:$0xff]  ;;  %v100_v13 = vld [vmem:[#allocation2 + $0x38] sm:$0xff]  ;;  %v1454_v25 = vld [vmem:[#allocation8] sm:$0xff]  }
  0x65   :  { %v1132_v10 = vcombine.low %v95_v8, %v99_v9  ;;  %v1133_v11 = vcombine.high %v95_v8, %v99_v9  ;;  %v1134_v14 = vcombine.low %v96_v12, %v100_v13  ;;  %v1135_v15 = vcombine.high %v96_v12, %v100_v13  ;;  %v1448_v19 = vld [vmem:[#allocation7 + $0x10] sm:$0xff]   ;;  %v1449_v20 = vld [vmem:[#allocation7 + $0x18] sm:$0xff]  }
  0x66   :  { %1234 = vmatpush3.bf16.msra.mxu0 %v1408_v26  ;;  %v1452_v23 = vld [vmem:[#allocation7 + $0x30] sm:$0xff]   ;;  %v1453_v24 = vld [vmem:[#allocation7 + $0x38] sm:$0xff]   ;;  %v1455_v26 = vld [vmem:[#allocation8 + $0x8] sm:$0xff]  }
  0x67   :  { %1256 = vmatpush3.bf16.msra.mxu1 %v1409_v27  ;;  %1235 = vmatprep.subr.bf16.mxu0 %v1410_v28  ;;  %v1456_v27 = vld [vmem:[#allocation8 + $0x10] sm:$0xff]   ;;  %v1457_v28 = vld [vmem:[#allocation8 + $0x18] sm:$0xff]  }
  0x68   :  { %1257 = vmatprep.subr.bf16.mxu1 %v1411_v29  ;;  %v1458_v29 = vld [vmem:[#allocation8 + $0x20] sm:$0xff]  }
  0x6a   :  { %1236 = vmatpush3.bf16.msra.mxu0 %v1412_v30  ;;  %v1459_v30 = vld [vmem:[#allocation8 + $0x28] sm:$0xff]  }
  0x6b   :  { %1258 = vmatpush3.bf16.msra.mxu1 %v1413_v31  ;;  %1265 = vmatprep.subr.bf16.mxu0 %v1414_v40 }
  0x6c   :  { %1287 = vmatprep.subr.bf16.mxu1 %v1415_v41 }
  0x6d   :  { %691 = vmatmul.mubr.bf16.vlgmr.msra.gmra.mrb[0].mxu0 %v1128_v35 }
  0x6e   :  { %732 = vmatmul.mubr.bf16.vlgmr.msra.gmra.mrb[0].mxu1 %v1130_v38  ;;  %1266 = vmatpush3.bf16.msra.mxu0 %v1416_v42 }
  0x6f   :  { %1288 = vmatpush3.bf16.msra.mxu1 %v1417_v43  ;;  %1267 = vmatprep.subr.bf16.mxu0 %v1418_v44 }
  0x70   :  { %1289 = vmatprep.subr.bf16.mxu1 %v1419_v45  ;;  %772 = vmatprep.mubr.bf16.mxu0 %v1133_v11 }
  0x71   :  { %813 = vmatprep.mubr.bf16.mxu1 %v1135_v15 }
  0x72   :  { %1268 = vmatpush3.bf16.msra.mxu0 %v1420_v46 }
  0x73   :  { %1290 = vmatpush3.bf16.msra.mxu1 %v1421_v47  ;;  %1269 = vmatprep.subr.bf16.mxu0 %v1422_v48 }
  0x74   :  { %1291 = vmatprep.subr.bf16.mxu1 %v1423_v49 }
  0x76   :  { %1270 = vmatpush3.bf16.msra.mxu0 %v1424_v50 }
  0x77   :  { %1292 = vmatpush3.bf16.msra.mxu1 %v1425_v51  ;;  %1271 = vmatprep.subr.bf16.mxu0 %v1426_v52 }
  0x78   :  { %1293 = vmatprep.subr.bf16.mxu1 %v1427_v53 }
  0x7a   :  { %1272 = vmatpush3.bf16.msra.mxu0 %v1428_v54 }
  0x7b   :  { %1294 = vmatpush3.bf16.msra.mxu1 %v1429_v55  ;;  %1273 = vmatprep.subr.bf16.mxu0 %v1430_v56 }
  0x7c   :  { %1295 = vmatprep.subr.bf16.mxu1 %v1431_v57  ;;  %v1200_v57 = vld [vmem:[%s1845_s2] ss:$0 sm:$0xff] }
  0x7e   :  { %1274 = vmatpush3.bf16.msra.mxu0 %v1432_v58 }
  0x7f   :  { %1296 = vmatpush3.bf16.msra.mxu1 %v1433_v59  ;;  %1275 = vmatprep.subr.bf16.mxu0 %v1434_v60 }
  0x80   :  { %1297 = vmatprep.subr.bf16.mxu1 %v1435_v61  ;;  %v1201_v61 = vld [vmem:[%s1846_s3] ss:$0 sm:$0xff] }
  0x82   :  { %1276 = vmatpush3.bf16.msra.mxu0 %v1436_v62 }
  0x83   :  { %1298 = vmatpush3.bf16.msra.mxu1 %v1437_v63  ;;  %1277 = vmatprep.subr.bf16.mxu0 %v1438_v0 }
  0x84   :  { %1299 = vmatprep.subr.bf16.mxu1 %v1439_v1 }
  0x86   :  { %1278 = vmatpush3.bf16.msra.mxu0 %v1440_v2 }
  0x87   :  { %1300 = vmatpush3.bf16.msra.mxu1 %v1441_v3  ;;  %1279 = vmatprep.subr.bf16.mxu0 %v1442_v4  ;;  %v1460_v4 = vld [vmem:[#allocation8 + $0x30] sm:$0xff]  }
  0x88   :  { %1301 = vmatprep.subr.bf16.mxu1 %v1443_v5  ;;  %v1461_v5 = vld [vmem:[#allocation8 + $0x38] sm:$0xff]  }
  0x8a   :  { %1280 = vmatpush3.bf16.msra.mxu0 %v1444_v6  ;;  %v1210_v6 = vld [vmem:[%s1848_s5] ss:$0 sm:$0xff]  ;;  %s1550_s5 = scalar_lea.vmem %s1096_s17, 256 }
  0x8b   :  { %1302 = vmatpush3.bf16.msra.mxu1 %v1445_v7  ;;  %1327 = vmatprep.subr.bf16.mxu0 %v1634_v17  ;;  %v1211_v7 = vld [vmem:[%s1849_s6] ss:$0 sm:$0xff]  ;;  %p1551_p4 = scmp.ne.s32.totalorder %s1096_s17, %s1550_s5  ;;  %p1556_p6 = scmp.lt.s32.totalorder %s1550_s5, %s1550_s5 }
  0x8c   :  { %1347 = vmatprep.subr.bf16.mxu1 %v1634_v17 }
  0x8d   :  { %773 = vmatmul.mubr.bf16.vlgmr.msra.gmra.mrb[4].mxu0 %v1132_v10  ;;  %p1557_p7 = por %p1556_p6, %p1555_p5 }
  0x8e   :  { %814 = vmatmul.mubr.bf16.vlgmr.msra.gmra.mrb[4].mxu1 %v1134_v14  ;;  %1328 = vmatpush3.bf16.msra.mxu0 %v1446_v16 }
  0x8f   :  { %1329 = vmatprep.subr.bf16.mxu0 %v1634_v17  ;;  %1343 = vmatprep.mubr.msk.bf16.mxu0 %vm1635_vm0, %v1634_v17  ;;  %p1558_p8 = pnand %p1557_p7, %p1551_p4 }
  0x90   :  { %1363 = vmatprep.mubr.msk.bf16.mxu1 %vm1635_vm0, %v1634_v17  ;;  %1348 = vmatpush3.bf16.msra.mxu1 %v1454_v25 }
  0x91   :  { %1349 = vmatprep.subr.bf16.mxu1 %v1634_v17 }
  0x92   :  { %1330 = vmatpush3.bf16.msra.mxu0 %v1447_v18 }
  0x93   :  { %1331 = vmatprep.subr.bf16.mxu0 %v1634_v17 }
  0x94   :  { %1350 = vmatpush3.bf16.msra.mxu1 %v1455_v26 }
  0x95   :  { %1351 = vmatprep.subr.bf16.mxu1 %v1634_v17 }
  0x96   :  { %1332 = vmatpush3.bf16.msra.mxu0 %v1448_v19 }
  0x97   :  { %1333 = vmatprep.subr.bf16.mxu0 %v1634_v17 }
  0x98   :  { %1352 = vmatpush3.bf16.msra.mxu1 %v1456_v27 }
  0x99   :  { %1353 = vmatprep.subr.bf16.mxu1 %v1634_v17 }
  0x9a   :  { %1334 = vmatpush3.bf16.msra.mxu0 %v1449_v20 }
  0x9b   :  { %1335 = vmatprep.subr.bf16.mxu0 %v1634_v17 }
  0x9c   :  { %1354 = vmatpush3.bf16.msra.mxu1 %v1457_v28 }
  0x9d   :  { %1355 = vmatprep.subr.bf16.mxu1 %v1634_v17 }
  0x9e   :  { %1336 = vmatpush3.bf16.msra.mxu0 %v1450_v21 }
  0x9f   :  { %1337 = vmatprep.subr.bf16.mxu0 %v1634_v17 }
  0xa0   :  { %1356 = vmatpush3.bf16.msra.mxu1 %v1458_v29 }
  0xa1   :  { %1357 = vmatprep.subr.bf16.mxu1 %v1634_v17 }
  0xa2   :  { %1338 = vmatpush3.bf16.msra.mxu0 %v1451_v22 }
  0xa3   :  { %1339 = vmatprep.subr.bf16.mxu0 %v1634_v17 }
  0xa4   :  { %1358 = vmatpush3.bf16.msra.mxu1 %v1459_v30 }
  0xa5   :  { %1359 = vmatprep.subr.bf16.mxu1 %v1634_v17 }
  0xa6   :  { %1340 = vmatpush3.bf16.msra.mxu0 %v1452_v23 }
  0xa7   :  { %1341 = vmatprep.subr.bf16.mxu0 %v1634_v17 }
  0xa8   :  { %1360 = vmatpush3.bf16.msra.mxu1 %v1460_v4 }
  0xa9   :  { %1361 = vmatprep.subr.bf16.mxu1 %v1634_v17 }
  0xaa   :  { %1342 = vmatpush3.bf16.msra.mxu0 %v1453_v24 }
  0xac   :  { %1362 = vmatpush3.bf16.msra.mxu1 %v1461_v5 }
 0x140   :  { %v1237_v31 = vpop.f32.mrb[0].mxu0 }
 0x141   :  { %v1259_v32 = vpop.f32.mrb[0].mxu1  ;;  %v1238_v33 = vpop.f32.mrb[1].mxu0 }
 0x142   :  { %v1239_v34 = vadd.f32 %v1238_v33, %v1237_v31  ;;  %v1260_v35 = vpop.f32.mrb[1].mxu1  ;;  %v1240_v36 = vpop.f32.mrb[2].mxu0 }
 0x143   :  { %v1261_v37 = vadd.f32 %v1260_v35, %v1259_v32  ;;  %v1262_v38 = vpop.f32.mrb[2].mxu1  ;;  %v1241_v39 = vpop.f32.mrb[3].mxu0 }
 0x144   :  { %v1242_v40 = vadd.f32 %v1241_v39, %v1240_v36  ;;  %v1263_v41 = vpop.f32.mrb[3].mxu1 }
 0x145   :  { %v734_v42 = vadd.f32 %v1261_v37, %v1239_v34  ;;  %v1264_v43 = vadd.f32 %v1263_v41, %v1262_v38 }
 0x147   :  { %v737_v44 = vadd.f32 %v1264_v43, %v1242_v40 }
 0x160   :  { %v1281_v45 = vpop.f32.mrb[4].mxu0 }
 0x161   :  { %v1303_v46 = vpop.f32.mrb[4].mxu1  ;;  %v1282_v47 = vpop.f32.mrb[5].mxu0 }
 0x162   :  { %v1283_v48 = vadd.f32 %v1282_v47, %v1281_v45  ;;  %v1304_v49 = vpop.f32.mrb[5].mxu1  ;;  %v1284_v50 = vpop.f32.mrb[6].mxu0 }
 0x163   :  { %v1305_v51 = vadd.f32 %v1304_v49, %v1303_v46  ;;  %v1306_v52 = vpop.f32.mrb[6].mxu1  ;;  %v1285_v53 = vpop.f32.mrb[7].mxu0 }
 0x164   :  { %v775_v54 = vadd.f32 %v1283_v48, %v734_v42  ;;  %v1286_v55 = vadd.f32 %v1285_v53, %v1284_v50  ;;  %v1307_v56 = vpop.f32.mrb[7].mxu1 }
 0x165   :  { %v1308_v58 = vadd.f32 %v1307_v56, %v1306_v52 }
 0x166   :  { %v816_v59 = vadd.f32 %v1305_v51, %v775_v54  ;;  %v778_v60 = vadd.f32 %v1286_v55, %v737_v44 }
 0x168   :  { %v828_v62 = vsub.f32 %v816_v59, %v1200_v57  ;;  %v819_v63 = vadd.f32 %v1308_v58, %v778_v60 }
 0x16a   :  { %v836_v0 = vmul.f32 %v1201_v61, %v828_v62  ;;  %v829_v1 = vsub.f32 %v819_v63, %v1200_v57 }
 0x16c   :  { %838 = vst [vmem:[#allocation11] sm:$0xff] %v836_v0  ;;  %v837_v2 = vmul.f32 %v1201_v61, %v829_v1 }
 0x16e   :  { %839 = vst [vmem:[#allocation11 + $0x8] sm:$0xff] %v837_v2  ;;  %v840_v3 = vpack.c.bf16 %v837_v2, %v836_v0 }
 0x170   :  { %1344 = vmatmul.mubr.bf16.vlgmr.msra.gmra.mrb[8].mxu0 %v840_v3 }
 0x243   :  { %v939_v8 = vpop.f32.mrb[8].mxu0 }
 0x244   :  { %v952_v9 = vsub.f32 %v939_v8, %v1210_v6  ;;  %v1345_v10 = vpop.f32.mrb[9].mxu0 }
 0x245   :  { %v942_v11 = vpop.f32.mrb[10].mxu0 }
 0x246   :  { %v960_v12 = vmul.f32 %v1211_v7, %v952_v9  ;;  %v953_v13 = vsub.f32 %v942_v11, %v1210_v6  ;;  %v1346_v14 = vpop.f32.mrb[11].mxu0 }
 0x248   :  { %962 = vst [vmem:[#allocation13] sm:$0xff] %v960_v12  ;;  %v961_v15 = vmul.f32 %v1211_v7, %v953_v13 }
 0x24a   :  { %963 = vst [vmem:[#allocation13 + $0x8] sm:$0xff] %v961_v15  ;;  %v964_v16 = vpack.c.bf16 %v961_v15, %v960_v12 }
 0x24c   :  { %1364 = vmatmul.mubr.bf16.vlgmr.msra.gmra.mrb[8].mxu1 %v964_v16 }
 0x24d   :  { %1561 = shalt.err (!%p1558_p8)
}
 0x24e   :  { %s1562_s20 = scalar_lea.hbm %s1853_s10, 256 }
 0x24f   :  { %p1563_p9 = scmp.ne.s32.totalorder %s1853_s10, %s1562_s20  ;;  %p1566_p10 = scmp.lt.u32.totalorder %s1562_s20, %s1853_s10 }
 0x251   :  { %p1568_p11 = pnand %p1566_p10, %p1563_p9 }
 0x253   :  { %1571 = shalt.err (!%p1568_p11)
}
 0x254   :  { %s1637_s1 = smov 128   ;;  %s1638_s18 = smov 8  }
 0x255   :  { %1101 = dma.vmem_to_hbm [thread:$0]  %s1096_s17, 256, %s1853_s10, [#allocation12], %s1637_s1, %s1637_s1, %s1638_s18  }
 0x256   :  { %s1639_s25 = smov [#allocation13]  }
 0x257   :  { %s1107_s29 = sshll.u32 %s1639_s25, 4  ;;  %s1108_s29 = int_to_ptr.vmem [resolvable:$true] %s1107_s29 }
 0x258   :  { %s1572_s12 = scalar_lea.vmem %s1108_s29, 256  ;;  %p1577_p13 = scmp.lt.s32.totalorder %s1108_s29, %s1108_s29 }
 0x259   :  { %p1573_p12 = scmp.ne.s32.totalorder %s1108_s29, %s1572_s12  ;;  %p1578_p0 = scmp.lt.s32.totalorder %s1572_s12, %s1572_s12 }
 0x25b   :  { %p1579_p1 = por %p1578_p0, %p1577_p13 }
 0x25d   :  { %p1580_p2 = pnand %p1579_p1, %p1573_p12 }
 0x25f   :  { %1583 = shalt.err (!%p1580_p2)
}
 0x260   :  { %s1584_s7 = scalar_lea.hbm %s1854_s11, 256 }
 0x261   :  { %p1585_p3 = scmp.ne.s32.totalorder %s1854_s11, %s1584_s7  ;;  %p1588_p4 = scmp.lt.u32.totalorder %s1584_s7, %s1854_s11 }
 0x263   :  { %p1590_p5 = pnand %p1588_p4, %p1585_p3 }
 0x265   :  { %1593 = shalt.err (!%p1590_p5)
}
 0x266   :  { %1113 = dma.vmem_to_hbm [thread:$0]  %s1108_s29, 256, %s1854_s11, [#allocation12], %s1637_s1, %s1637_s1, %s1638_s18  }
 0x267   :  { %v1212_v17 = vld [vmem:[%s1851_s8] ss:$0 sm:$0xff]  ;;  %s1640_s16 = smov [#allocation10]  }
 0x268   :  { %s1083_s17 = sshll.u32 %s1640_s16, 4  ;;  %s1084_s17 = int_to_ptr.vmem [resolvable:$true] %s1083_s17 }
 0x269   :  { %s1594_s5 = scalar_lea.vmem %s1084_s17, 256  ;;  %p1599_p7 = scmp.lt.s32.totalorder %s1084_s17, %s1084_s17 }
 0x26a   :  { %p1595_p6 = scmp.ne.s32.totalorder %s1084_s17, %s1594_s5  ;;  %p1600_p8 = scmp.lt.s32.totalorder %s1594_s5, %s1594_s5 }
 0x26c   :  { %p1601_p9 = por %p1600_p8, %p1599_p7 }
 0x26e   :  { %p1602_p10 = pnand %p1601_p9, %p1595_p6 }
 0x31f   :  { %v1069_v18 = vpop.f32.mrb[8].mxu1 }
 0x320   :  { %v1070_v19 = vadd.f32 %v1212_v17, %v1069_v18  ;;  %v1365_v20 = vpop.f32.mrb[9].mxu1 }
 0x321   :  { %v1072_v21 = vpop.f32.mrb[10].mxu1 }
 0x322   :  { %1076 = vst [vmem:[#allocation10] sm:$0xff] %v1070_v19  ;;  %v1073_v22 = vadd.f32 %v1212_v17, %v1072_v21  ;;  %v1366_v23 = vpop.f32.mrb[11].mxu1 }
 0x324   :  { %1077 = vst [vmem:[#allocation10 + $0x8] sm:$0xff] %v1073_v22 }
 0x325   :  { %1605 = shalt.err (!%p1602_p10)
}
 0x326   :  { %s1606_s6 = scalar_lea.hbm %s1852_s9, 256 }
 0x327   :  { %p1607_p11 = scmp.ne.s32.totalorder %s1852_s9, %s1606_s6  ;;  %p1610_p12 = scmp.lt.u32.totalorder %s1606_s6, %s1852_s9 }
 0x329   :  { %p1612_p13 = pnand %p1610_p12, %p1607_p11 }
 0x32b   :  { %1615 = shalt.err (!%p1612_p13)
}
 0x32c   :  { %1089 = dma.vmem_to_hbm [thread:$0]  %s1084_s17, 256, %s1852_s9, [#allocation4], %s1637_s1, %s1637_s1, %s1638_s18  }
 0x32d   :  { %1622 = dma.done.wait [#allocation4], 256  }
 0x32e   :  { %1623 = vsyncadd [#allocation4], 4294967040 }
 0x32f   :  { %1624 = dma.done.wait [#allocation12], 512  }
 0x330   :  { %1625 = vsyncadd [#allocation12], 4294966784 }
 0x331   :  { %1123 = vsyncpa [#allocation3], 1 }
 0x332   :  { %1124 = vsyncpa [#allocation6], 1 }
 0x333   :  { %1125 = vsyncpa [#allocation9], 1 }
 0x334   :  { %1126 = vsyncpa [#allocation4], 1 }
 0x335   :  { %1127 = vsyncpa [#allocation12], 1 }

</bundles_post_ra>
